<compile_context>
chip_gen: v5e
topology: v5e:2x2
jax: 0.10.0
libtpu: 0.0.40
codegen_flags: <defaults>
</compile_context>

<pallas_src>
import functools

import numpy as np

import jax
import jax.numpy as jnp
from jax import lax
from jax.experimental import pallas as pl
from jax.experimental.pallas import tpu as pltpu


# ----------------------------------------------------------------------------
# Counter-based in-kernel normal generator (TPU + interpret-mode safe)
# ----------------------------------------------------------------------------
def _mix32(h):
    """Murmur-style int32 finalizer (arithmetic shifts are fine for mixing)."""
    h = h ^ (h >> 16)
    h = h * jnp.int32(2146121773)      # 0x7FEB352D
    h = h ^ (h >> 15)
    h = h * jnp.int32(-2073179509)     # 0x846CA68B
    h = h ^ (h >> 16)
    return h


def _normal_from_index(idx, seed, salt):
    """~N(0,1) per int32 index: sum of 12 hashed U(0,1) draws minus 6 (Irwin-Hall)."""
    base = idx * jnp.int32(-1640531527) + (seed + jnp.int32(salt)) * jnp.int32(374761393)
    acc = jnp.zeros(idx.shape, jnp.float32)
    for k in range(12):                               # static unroll, pure VPU int ops
        h = _mix32(base + jnp.int32(k * 16777619))
        acc = acc + (h & jnp.int32(0x7FFFFF)).astype(jnp.float32)
    return acc * jnp.float32(1.0 / 8388608.0) - jnp.float32(6.0)


# ----------------------------------------------------------------------------
# Standalone GaussianNoise module (the spec module) as a Pallas kernel
# ----------------------------------------------------------------------------
def _gaussian_noise_kernel(seed_ref, x_ref, o_ref, *, std):
    rows, cols = x_ref.shape
    row = lax.broadcasted_iota(jnp.int32, (rows, cols), 0) + pl.program_id(0) * rows
    col = lax.broadcasted_iota(jnp.int32, (rows, cols), 1)
    idx = row * cols + col
    noise = _normal_from_index(idx, seed_ref[0], salt=0x5EED) * jnp.float32(std)
    o_ref[...] = (x_ref[...].astype(jnp.float32) + noise).astype(o_ref.dtype)


def gaussian_noise(x, *, std=0.1, training=False, seed=0,
                   max_block_bytes=2 * 1024 * 1024):
    """PyTorch GaussianNoise.forward: identity in eval, x + N(0, std) in training."""
    if not training:
        return x                                       # eval: exact identity, no launch

    orig_shape, dtype = x.shape, x.dtype
    n = x.size
    lanes = 128
    rows = pl.cdiv(n, lanes)
    flat = x.reshape(-1)                               # native dtype, no f32 round trip
    pad = rows * lanes - n
    if pad:
        # TODO(synk): ragged tail (<128 elems) is padded; a masked last tile would avoid it.
        flat = jnp.concatenate([flat, jnp.zeros((pad,), dtype)])
    x2 = flat.reshape(rows, lanes)

    # Largest lane-dense tile such that in+out double-buffering stays far below the
    # scoped VMEM limit on every generation (v7x: 64 MiB physical / 32 MiB scoped).
    br_cap = max(8, (max_block_bytes // (lanes * x.dtype.itemsize)) // 8 * 8)
    if rows <= br_cap:
        block_rows, grid = rows, (1,)
    else:
        block_rows, grid = br_cap, (pl.cdiv(rows, br_cap),)

    out = pl.pallas_call(
        functools.partial(_gaussian_noise_kernel, std=float(std)),
        out_shape=jax.ShapeDtypeStruct((rows, lanes), dtype),
        grid=grid,
        in_specs=[pl.BlockSpec(memory_space=pltpu.MemorySpace.SMEM),
                  pl.BlockSpec((block_rows, lanes), lambda i: (i, 0))],
        out_specs=pl.BlockSpec((block_rows, lanes), lambda i: (i, 0)),
        compiler_params=pltpu.CompilerParams(
            dimension_semantics=("parallel",),
            vmem_limit_bytes=32 * 1024 * 1024),
    )(jnp.asarray([seed], jnp.int32), x2)
    # NOTE: input_output_aliases={1: 0} would turn this into in-place x += noise when the
    # caller donates x; left off so the demo can still read the original input.
    out = out.reshape(-1)
    if pad:
        out = out[:n]
    return out.reshape(orig_shape)


# ----------------------------------------------------------------------------
# Fused discriminator forward kernel (batch folded into the matmul M dimension)
# ----------------------------------------------------------------------------
def _disc_kernel(x_ref, sel0_ref, w0_ref, b0_ref,
                 sel1_ref, w1_ref, b1_ref,
                 wq_ref, bq_ref, wk_ref, bk_ref, wv_ref, bv_ref,
                 mask_ref, w2f_ref, pool_ref, b2_ref,
                 gamma_ref, seed_ref, o_ref, *, training, std, slope):
    f32, bf16 = jnp.float32, jnp.bfloat16

    def add_noise(a, salt):
        # GaussianNoise: identity in eval; counter-based normal sized exactly to `a`.
        if not training:
            return a
        r, c = a.shape
        row = lax.broadcasted_iota(jnp.int32, (r, c), 0) + pl.program_id(0) * r
        col = lax.broadcasted_iota(jnp.int32, (r, c), 1)
        idx = row * c + col
        return a + _normal_from_index(idx, seed_ref[0], salt) * jnp.float32(std)

    def leaky(a):
        return jnp.where(a >= 0.0, a, slope * a)

    def conv(h, sel_ref, w_ref, b_ref):
        # conv = sum_t Sel_t @ h @ W_t with the batch folded into M (Sel_t is
        # block-diagonal over the images in this grid block), so every MXU push sees
        # M = B_pb*s_out rows instead of s_out.
        # TODO(synk): a single (C_in*s_in, C_out*s_out) conv matrix would collapse the
        # tap loop to one matmul, but it needs per-image flat activations which would
        # then require an in-kernel relayout before the attention block.
        n_taps = sel_ref.shape[0]
        h_bf = h.astype(bf16)
        acc = jnp.zeros((sel_ref.shape[1], w_ref.shape[2]), f32)
        for t in range(n_taps):
            g = jnp.dot(sel_ref[t], h_bf, preferred_element_type=f32)      # (M, C_in)
            acc = acc + jnp.dot(g.astype(bf16), w_ref[t], preferred_element_type=f32)
        return acc + b_ref[...]

    # layer 0: GaussianNoise -> Conv(3->8, k4 s2 p1) -> LeakyReLU(0.1)
    h = add_noise(x_ref[...].astype(f32), salt=101)            # (B_pb*256, 3)
    h = leaky(conv(h, sel0_ref, w0_ref, b0_ref))               # (B_pb*64, 8)

    # layer 1: GaussianNoise -> Conv(8->16, k4 s2 p1) -> LeakyReLU(0.1)
    h = add_noise(h, salt=202)
    h = leaky(conv(h, sel1_ref, w1_ref, b1_ref))               # (B_pb*16, 16)

    # Self_Attn: q/k/v 1x1 convs + block-masked softmax, fully batch-folded.
    h_bf = h.astype(bf16)
    q = jnp.dot(h_bf, wq_ref[...], preferred_element_type=f32) + bq_ref[...]   # (B_pb*16, 2)
    k = jnp.dot(h_bf, wk_ref[...], preferred_element_type=f32) + bk_ref[...]
    v = jnp.dot(h_bf, wv_ref[...], preferred_element_type=f32) + bv_ref[...]   # (B_pb*16, 16)
    energy = lax.dot_general(q.astype(bf16), k.astype(bf16),
                             (((1,), (1,)), ((), ())),
                             preferred_element_type=f32) + mask_ref[...]
    m = jnp.max(energy, axis=-1, keepdims=True)
    p = jnp.exp(energy - m)                                    # cross-image terms -> 0
    attn = p / jnp.sum(p, axis=-1, keepdims=True)              # exact divide (review note)
    attn_out = jnp.dot(attn.astype(bf16), v.astype(bf16), preferred_element_type=f32)
    h = gamma_ref[0] * attn_out + h

    # GaussianNoise -> final Conv(16->1, k4 s1 p0): full per-image reduction.
    h = add_noise(h, salt=303)
    rowsum = jnp.sum(h * w2f_ref[...], axis=1, keepdims=True)          # (B_pb*16, 1)
    logits = jnp.sum(rowsum * pool_ref[...], axis=0, keepdims=True)    # (1, B_pb)
    o_ref[0] = (logits + b2_ref[...]).astype(o_ref.dtype)              # one lane-dense write


def _resident_spec(a):
    zeros = (0,) * a.ndim

    def idx(i):
        return zeros

    return pl.BlockSpec(a.shape, idx)


def discriminator_forward(kparams, x_nchw, *, training=False, seed=0, std=0.1):
    """Discriminator(image_size=16, conv_dim=8) forward as one fused Pallas call."""
    B, C_in, H, W = x_nchw.shape
    b_pb = kparams["batch_per_block"]
    assert B % b_pb == 0
    num_blocks = B // b_pb
    s_in = H * W
    assert kparams["sel0"].shape[2] == b_pb * s_in and kparams["w0t"].shape[1] == C_in

    # (B, C, H, W) -> (B*H*W, C): spatial-major rows, channels on lanes, batch in M.
    x_all = jnp.transpose(x_nchw.reshape(B, C_in, s_in), (0, 2, 1)).reshape(B * s_in, C_in)
    x_all = x_all.astype(jnp.float32)

    weights = (kparams["sel0"], kparams["w0t"], kparams["b0"],
               kparams["sel1"], kparams["w1t"], kparams["b1"],
               kparams["wq"], kparams["bq"], kparams["wk"], kparams["bk"],
               kparams["wv"], kparams["bv"],
               kparams["mask"], kparams["w2f"], kparams["pool"], kparams["b2"])

    smem = pl.BlockSpec(memory_space=pltpu.MemorySpace.SMEM)
    in_specs = ([pl.BlockSpec((b_pb * s_in, C_in), lambda i: (i, 0))]
                + [_resident_spec(a) for a in weights]
                + [smem, smem])

    out = pl.pallas_call(
        functools.partial(_disc_kernel, training=training, std=float(std), slope=0.1),
        out_shape=jax.ShapeDtypeStruct((num_blocks, 1, b_pb), jnp.float32),
        grid=(num_blocks,),
        in_specs=in_specs,
        out_specs=pl.BlockSpec((1, 1, b_pb), lambda i: (i, 0, 0)),
        compiler_params=pltpu.CompilerParams(
            dimension_semantics=("parallel",),            # num_blocks=2 feeds both v7x TCs
            vmem_limit_bytes=32 * 1024 * 1024),
        cost_estimate=pl.CostEstimate(flops=8_000_000, transcendentals=1_024,
                                      bytes_accessed=3_000_000),
    )(x_all, *weights, kparams["gamma"], jnp.asarray([seed], jnp.int32))
    return out.reshape(B)


# ----------------------------------------------------------------------------
# Parameter construction (plain JAX / numpy preprocessing, outside the hot path)
# ----------------------------------------------------------------------------
def spectral_normalize(w, n_iter=5):
    # TODO(synk): approximation of PyTorch SpectralNorm (deterministic power iteration).
    c_out = w.shape[0]
    w_mat = w.reshape(c_out, -1)
    u = jnp.ones((c_out,), w.dtype) / jnp.sqrt(jnp.asarray(c_out, w.dtype))
    v = None
    for _ in range(n_iter):
        v = w_mat.T @ u
        v = v / (jnp.linalg.norm(v) + 1e-12)
        u = w_mat @ v
        u = u / (jnp.linalg.norm(u) + 1e-12)
    sigma = u @ (w_mat @ v)
    return w / sigma


def init_conv(key, c_out, c_in, k):
    kw, kb = jax.random.split(key)
    fan_in = c_in * k * k
    bound = 1.0 / (fan_in ** 0.5)
    w = jax.random.uniform(kw, (c_out, c_in, k, k), jnp.float32, -bound, bound)
    b = jax.random.uniform(kb, (c_out,), jnp.float32, -bound, bound)
    return w, b


def make_raw_params(key, conv_dim=8):
    keys = jax.random.split(key, 6)
    w0, b0 = init_conv(keys[0], conv_dim, 3, 4)
    w1, b1 = init_conv(keys[1], 2 * conv_dim, conv_dim, 4)
    curr = 2 * conv_dim
    wq, bq = init_conv(keys[2], curr // 8, curr, 1)
    wk, bk = init_conv(keys[3], curr // 8, curr, 1)
    wv, bv = init_conv(keys[4], curr, curr, 1)
    w2, b2 = init_conv(keys[5], 1, curr, 4)
    return {"w0": spectral_normalize(w0), "b0": b0,
            "w1": spectral_normalize(w1), "b1": b1,
            "wq": wq, "bq": bq, "wk": wk, "bk": bk, "wv": wv, "bv": bv,
            "gamma": jnp.zeros((1,), jnp.float32),   # nn.Parameter(torch.zeros(1))
            "w2": w2, "b2": b2}


def build_selection(H, W, KH, KW, stride, pad):
    """0/1 selection matrices sel[t, out_pos, in_pos]; zero rows encode zero-padding."""
    Ho = (H + 2 * pad - KH) // stride + 1
    Wo = (W + 2 * pad - KW) // stride + 1
    sel = np.zeros((KH * KW, Ho * Wo, H * W), np.float32)
    for kh in range(KH):
        for kw in range(KW):
            t = kh * KW + kw
            for ho in range(Ho):
                for wo in range(Wo):
                    h = ho * stride + kh - pad
                    w = wo * stride + kw - pad
                    if 0 <= h < H and 0 <= w < W:
                        sel[t, ho * Wo + wo, h * W + w] = 1.0
    return sel


def _block_diag_taps(sel, b_pb):
    """Fold the batch into the M dimension: per-tap block-diagonal selection matrices."""
    eye = np.eye(b_pb, dtype=np.float32)
    return np.stack([np.kron(eye, sel[t]) for t in range(sel.shape[0])])


def pack_params(raw, image_size=16, batch_per_block=1):
    bf16, f32 = jnp.bfloat16, jnp.float32
    H0 = image_size
    H1 = (H0 + 2 - 4) // 2 + 1
    H2 = (H1 + 2 - 4) // 2 + 1
    N2 = H2 * H2
    C2 = raw["w1"].shape[0]
    assert raw["w2"].shape[-1] == H2, "final conv must reduce the map to 1x1"

    def per_tap(w):                                   # (O,I,KH,KW) -> (KH*KW, I, O)
        arr = np.asarray(w)
        O, I, KH, KW = arr.shape
        return jnp.asarray(np.transpose(arr, (2, 3, 1, 0)).reshape(KH * KW, I, O), bf16)

    p = {"batch_per_block": batch_per_block}
    p["sel0"] = jnp.asarray(_block_diag_taps(build_selection(H0, H0, 4, 4, 2, 1),
                                             batch_per_block), bf16)
    p["w0t"] = per_tap(raw["w0"])
    p["b0"] = raw["b0"].reshape(1, -1).astype(f32)
    p["sel1"] = jnp.asarray(_block_diag_taps(build_selection(H1, H1, 4, 4, 2, 1),
                                             batch_per_block), bf16)
    p["w1t"] = per_tap(raw["w1"])
    p["b1"] = raw["b1"].reshape(1, -1).astype(f32)
    p["wq"] = raw["wq"][:, :, 0, 0].T.astype(bf16)
    p["bq"] = raw["bq"].reshape(1, -1).astype(f32)
    p["wk"] = raw["wk"][:, :, 0, 0].T.astype(bf16)
    p["bk"] = raw["bk"].reshape(1, -1).astype(f32)
    p["wv"] = raw["wv"][:, :, 0, 0].T.astype(bf16)
    p["bv"] = raw["bv"].reshape(1, -1).astype(f32)
    # block-diagonal softmax mask: 0 within an image's NxN block, -1e30 across images
    mask = np.full((batch_per_block * N2, batch_per_block * N2), -1e30, np.float32)
    for b in range(batch_per_block):
        mask[b * N2:(b + 1) * N2, b * N2:(b + 1) * N2] = 0.0
    p["mask"] = jnp.asarray(mask)
    w2f = np.transpose(np.asarray(raw["w2"])[0], (1, 2, 0)).reshape(N2, C2)
    p["w2f"] = jnp.asarray(np.tile(w2f, (batch_per_block, 1)), f32)
    pool = np.zeros((batch_per_block * N2, batch_per_block), np.float32)
    for b in range(batch_per_block):
        pool[b * N2:(b + 1) * N2, b] = 1.0
    p["pool"] = jnp.asarray(pool)
    p["b2"] = raw["b2"].reshape(1, 1).astype(f32)
    p["gamma"] = raw["gamma"].astype(f32)
    return p


# ----------------------------------------------------------------------------
# Pure-JAX reference (eval mode) for correctness checking
# ----------------------------------------------------------------------------
def _leaky_ref(x, s=0.1):
    return jnp.where(x >= 0, x, s * x)


def reference_forward(raw, x_nchw):
    dn = ("NCHW", "OIHW", "NCHW")
    y = lax.conv_general_dilated(x_nchw, raw["w0"], (2, 2), ((1, 1), (1, 1)),
                                 dimension_numbers=dn)
    y = _leaky_ref(y + raw["b0"][None, :, None, None])
    y = lax.conv_general_dilated(y, raw["w1"], (2, 2), ((1, 1), (1, 1)),
                                 dimension_numbers=dn)
    y = _leaky_ref(y + raw["b1"][None, :, None, None])
    B, C, H, W = y.shape
    N = H * W
    f = y.reshape(B, C, N)
    q = jnp.einsum("oc,bcn->bon", raw["wq"][:, :, 0, 0], f) + raw["bq"][None, :, None]
    k = jnp.einsum("oc,bcn->bon", raw["wk"][:, :, 0, 0], f) + raw["bk"][None, :, None]
    v = jnp.einsum("oc,bcn->bon", raw["wv"][:, :, 0, 0], f) + raw["bv"][None, :, None]
    energy = jnp.einsum("bci,bcj->bij", q, k)
    attn = jax.nn.softmax(energy, axis=-1)
    out = jnp.einsum("bcj,bij->bci", v, attn)
    y = raw["gamma"][0] * out.reshape(B, C, H, W) + y
    y = lax.conv_general_dilated(y, raw["w2"], (1, 1), ((0, 0), (0, 0)),
                                 dimension_numbers=dn)
    y = y + raw["b2"][None, :, None, None]
    return y.reshape(B)


# ----------------------------------------------------------------------------
if __name__ == "__main__":
    key = jax.random.PRNGKey(0)
    k_param, k_x = jax.random.split(key)
    x = jax.random.normal(k_x, (2, 3, 16, 16), jnp.float32)

    # --- standalone GaussianNoise (the spec module) --------------------------
    y_eval = gaussian_noise(x, std=0.1, training=False)            # identity in eval
    assert y_eval is x or np.array_equal(np.asarray(y_eval), np.asarray(x))

    y_tr = jax.block_until_ready(gaussian_noise(x, std=0.1, training=True, seed=7))
    assert y_tr.shape == x.shape and y_tr.dtype == x.dtype
    diff = np.asarray(y_tr - x).ravel()
    assert np.all(np.isfinite(diff))
    assert 0.05 < diff.std() < 0.2 and abs(diff.mean()) < 0.03
    y_tr2 = jax.block_until_ready(gaussian_noise(x, std=0.1, training=True, seed=7))
    assert np.array_equal(np.asarray(y_tr), np.asarray(y_tr2))      # deterministic per seed
    y_tr3 = jax.block_until_ready(gaussian_noise(x, std=0.1, training=True, seed=8))
    assert not np.array_equal(np.asarray(y_tr), np.asarray(y_tr3))

    # multi-block grid path + native bf16 dtype (no host-side f32 round trip)
    xb = jax.random.normal(jax.random.PRNGKey(1), (8, 3, 64, 64), jnp.bfloat16)
    yb = jax.block_until_ready(gaussian_noise(xb, std=0.1, training=True, seed=3,
                                              max_block_bytes=64 * 1024))
    assert yb.shape == xb.shape and yb.dtype == xb.dtype
    db = np.asarray((yb - xb).astype(jnp.float32)).ravel()
    assert np.all(np.isfinite(db)) and 0.05 < db.std() < 0.2

    # ragged (non multiple-of-128) shape
    xr = jax.random.normal(jax.random.PRNGKey(2), (5, 7, 11), jnp.float32)
    yr = jax.block_until_ready(gaussian_noise(xr, std=0.1, training=True, seed=4))
    assert yr.shape == xr.shape and bool(jnp.all(jnp.isfinite(yr)))

    # --- fused discriminator forward (embeds GaussianNoise) ------------------
    raw = make_raw_params(k_param, conv_dim=8)
    ref = reference_forward(raw, x)

    # b_pb=2: whole batch in one step (v5e/v6e single TC); b_pb=1: 2 parallel blocks (v7x).
    for b_pb in (2, 1):
        kp = pack_params(raw, image_size=16, batch_per_block=b_pb)
        out = jax.block_until_ready(discriminator_forward(kp, x, training=False))
        assert out.shape == (2,)
        np.testing.assert_allclose(np.asarray(out), np.asarray(ref), atol=2e-2, rtol=2e-2)

    # non-zero gamma exercises the attention residual path
    raw_g = dict(raw, gamma=jnp.full((1,), 0.5, jnp.float32))
    kp_g = pack_params(raw_g, image_size=16, batch_per_block=2)
    out_g = jax.block_until_ready(discriminator_forward(kp_g, x, training=False))
    np.testing.assert_allclose(np.asarray(out_g),
                               np.asarray(reference_forward(raw_g, x)),
                               atol=2e-2, rtol=2e-2)

    # training mode: GaussianNoise applied in-kernel at each stage
    kp2 = pack_params(raw, image_size=16, batch_per_block=2)
    out_tr = jax.block_until_ready(discriminator_forward(kp2, x, training=True, seed=123))
    assert out_tr.shape == (2,) and bool(jnp.all(jnp.isfinite(out_tr)))

    print("KERNEL_OK")
</pallas_src>

<mosaic_0001>
module attributes {stable_mosaic.version = 11 : i64} {
  func.func @_gaussian_noise_kernel(%arg0: i32, %arg1: memref<1xi32, #tpu.memory_space<smem>>, %arg2: memref<12x128xf32, #tpu.memory_space<vmem>>, %arg3: memref<12x128xf32, #tpu.memory_space<vmem>>) attributes {dimension_semantics = [#tpu.dimension_semantics<parallel>], iteration_bounds = array<i64: 1>, scalar_prefetch = 0 : i64, scratch_operands = 0 : i64, tpu.core_type = #tpu.core_type<tc>, window_params = [{transform_indices = @transform_0, window_bounds = array<i64: 1>}, {transform_indices = @transform_1, window_bounds = array<i64: 12, 128>}, {transform_indices = @transform_2, window_bounds = array<i64: 12, 128>}]} {
    %0 = tpu.iota {dimensions = array<i32: 0>} : vector<12x128xi32>
    %c12_i32 = arith.constant 12 : i32
    %1 = arith.muli %arg0, %c12_i32 : i32
    %2 = vector.broadcast %1 : i32 to vector<12x128xi32>
    %3 = arith.addi %0, %2 : vector<12x128xi32>
    %4 = tpu.iota {dimensions = array<i32: 1>} : vector<12x128xi32>
    %c128_i32 = arith.constant 128 : i32
    %5 = vector.broadcast %c128_i32 : i32 to vector<12x128xi32>
    %6 = arith.muli %3, %5 : vector<12x128xi32>
    %7 = arith.addi %6, %4 : vector<12x128xi32>
    %c0 = arith.constant 0 : index
    %8 = memref.load %arg1[%c0] : memref<1xi32, #tpu.memory_space<smem>>
    %c-1640531527_i32 = arith.constant -1640531527 : i32
    %9 = vector.broadcast %c-1640531527_i32 : i32 to vector<12x128xi32>
    %10 = arith.muli %7, %9 : vector<12x128xi32>
    %c24301_i32 = arith.constant 24301 : i32
    %11 = arith.addi %8, %c24301_i32 : i32
    %c374761393_i32 = arith.constant 374761393 : i32
    %12 = arith.muli %11, %c374761393_i32 : i32
    %13 = vector.broadcast %12 : i32 to vector<12x128xi32>
    %14 = arith.addi %10, %13 : vector<12x128xi32>
    %cst = arith.constant 0.000000e+00 : f32
    %15 = vector.broadcast %cst : f32 to vector<12x128xf32>
    %c0_i32 = arith.constant 0 : i32
    %16 = vector.broadcast %c0_i32 : i32 to vector<12x128xi32>
    %17 = arith.addi %14, %16 : vector<12x128xi32>
    %c16_i32 = arith.constant 16 : i32
    %18 = vector.broadcast %c16_i32 : i32 to vector<12x128xi32>
    %19 = arith.shrsi %17, %18 : vector<12x128xi32>
    %20 = arith.xori %17, %19 : vector<12x128xi32>
    %c2146121773_i32 = arith.constant 2146121773 : i32
    %21 = vector.broadcast %c2146121773_i32 : i32 to vector<12x128xi32>
    %22 = arith.muli %20, %21 : vector<12x128xi32>
    %c15_i32 = arith.constant 15 : i32
    %23 = vector.broadcast %c15_i32 : i32 to vector<12x128xi32>
    %24 = arith.shrsi %22, %23 : vector<12x128xi32>
    %25 = arith.xori %22, %24 : vector<12x128xi32>
    %c-2073179509_i32 = arith.constant -2073179509 : i32
    %26 = vector.broadcast %c-2073179509_i32 : i32 to vector<12x128xi32>
    %27 = arith.muli %25, %26 : vector<12x128xi32>
    %c16_i32_0 = arith.constant 16 : i32
    %28 = vector.broadcast %c16_i32_0 : i32 to vector<12x128xi32>
    %29 = arith.shrsi %27, %28 : vector<12x128xi32>
    %30 = arith.xori %27, %29 : vector<12x128xi32>
    %c8388607_i32 = arith.constant 8388607 : i32
    %31 = vector.broadcast %c8388607_i32 : i32 to vector<12x128xi32>
    %32 = arith.andi %30, %31 : vector<12x128xi32>
    %33 = arith.sitofp %32 : vector<12x128xi32> to vector<12x128xf32>
    %34 = arith.addf %15, %33 : vector<12x128xf32>
    %c16777619_i32 = arith.constant 16777619 : i32
    %35 = vector.broadcast %c16777619_i32 : i32 to vector<12x128xi32>
    %36 = arith.addi %14, %35 : vector<12x128xi32>
    %c16_i32_1 = arith.constant 16 : i32
    %37 = vector.broadcast %c16_i32_1 : i32 to vector<12x128xi32>
    %38 = arith.shrsi %36, %37 : vector<12x128xi32>
    %39 = arith.xori %36, %38 : vector<12x128xi32>
    %c2146121773_i32_2 = arith.constant 2146121773 : i32
    %40 = vector.broadcast %c2146121773_i32_2 : i32 to vector<12x128xi32>
    %41 = arith.muli %39, %40 : vector<12x128xi32>
    %c15_i32_3 = arith.constant 15 : i32
    %42 = vector.broadcast %c15_i32_3 : i32 to vector<12x128xi32>
    %43 = arith.shrsi %41, %42 : vector<12x128xi32>
    %44 = arith.xori %41, %43 : vector<12x128xi32>
    %c-2073179509_i32_4 = arith.constant -2073179509 : i32
    %45 = vector.broadcast %c-2073179509_i32_4 : i32 to vector<12x128xi32>
    %46 = arith.muli %44, %45 : vector<12x128xi32>
    %c16_i32_5 = arith.constant 16 : i32
    %47 = vector.broadcast %c16_i32_5 : i32 to vector<12x128xi32>
    %48 = arith.shrsi %46, %47 : vector<12x128xi32>
    %49 = arith.xori %46, %48 : vector<12x128xi32>
    %c8388607_i32_6 = arith.constant 8388607 : i32
    %50 = vector.broadcast %c8388607_i32_6 : i32 to vector<12x128xi32>
    %51 = arith.andi %49, %50 : vector<12x128xi32>
    %52 = arith.sitofp %51 : vector<12x128xi32> to vector<12x128xf32>
    %53 = arith.addf %34, %52 : vector<12x128xf32>
    %c33555238_i32 = arith.constant 33555238 : i32
    %54 = vector.broadcast %c33555238_i32 : i32 to vector<12x128xi32>
    %55 = arith.addi %14, %54 : vector<12x128xi32>
    %c16_i32_7 = arith.constant 16 : i32
    %56 = vector.broadcast %c16_i32_7 : i32 to vector<12x128xi32>
    %57 = arith.shrsi %55, %56 : vector<12x128xi32>
    %58 = arith.xori %55, %57 : vector<12x128xi32>
    %c2146121773_i32_8 = arith.constant 2146121773 : i32
    %59 = vector.broadcast %c2146121773_i32_8 : i32 to vector<12x128xi32>
    %60 = arith.muli %58, %59 : vector<12x128xi32>
    %c15_i32_9 = arith.constant 15 : i32
    %61 = vector.broadcast %c15_i32_9 : i32 to vector<12x128xi32>
    %62 = arith.shrsi %60, %61 : vector<12x128xi32>
    %63 = arith.xori %60, %62 : vector<12x128xi32>
    %c-2073179509_i32_10 = arith.constant -2073179509 : i32
    %64 = vector.broadcast %c-2073179509_i32_10 : i32 to vector<12x128xi32>
    %65 = arith.muli %63, %64 : vector<12x128xi32>
    %c16_i32_11 = arith.constant 16 : i32
    %66 = vector.broadcast %c16_i32_11 : i32 to vector<12x128xi32>
    %67 = arith.shrsi %65, %66 : vector<12x128xi32>
    %68 = arith.xori %65, %67 : vector<12x128xi32>
    %c8388607_i32_12 = arith.constant 8388607 : i32
    %69 = vector.broadcast %c8388607_i32_12 : i32 to vector<12x128xi32>
    %70 = arith.andi %68, %69 : vector<12x128xi32>
    %71 = arith.sitofp %70 : vector<12x128xi32> to vector<12x128xf32>
    %72 = arith.addf %53, %71 : vector<12x128xf32>
    %c50332857_i32 = arith.constant 50332857 : i32
    %73 = vector.broadcast %c50332857_i32 : i32 to vector<12x128xi32>
    %74 = arith.addi %14, %73 : vector<12x128xi32>
    %c16_i32_13 = arith.constant 16 : i32
    %75 = vector.broadcast %c16_i32_13 : i32 to vector<12x128xi32>
    %76 = arith.shrsi %74, %75 : vector<12x128xi32>
    %77 = arith.xori %74, %76 : vector<12x128xi32>
    %c2146121773_i32_14 = arith.constant 2146121773 : i32
    %78 = vector.broadcast %c2146121773_i32_14 : i32 to vector<12x128xi32>
    %79 = arith.muli %77, %78 : vector<12x128xi32>
    %c15_i32_15 = arith.constant 15 : i32
    %80 = vector.broadcast %c15_i32_15 : i32 to vector<12x128xi32>
    %81 = arith.shrsi %79, %80 : vector<12x128xi32>
    %82 = arith.xori %79, %81 : vector<12x128xi32>
    %c-2073179509_i32_16 = arith.constant -2073179509 : i32
    %83 = vector.broadcast %c-2073179509_i32_16 : i32 to vector<12x128xi32>
    %84 = arith.muli %82, %83 : vector<12x128xi32>
    %c16_i32_17 = arith.constant 16 : i32
    %85 = vector.broadcast %c16_i32_17 : i32 to vector<12x128xi32>
    %86 = arith.shrsi %84, %85 : vector<12x128xi32>
    %87 = arith.xori %84, %86 : vector<12x128xi32>
    %c8388607_i32_18 = arith.constant 8388607 : i32
    %88 = vector.broadcast %c8388607_i32_18 : i32 to vector<12x128xi32>
    %89 = arith.andi %87, %88 : vector<12x128xi32>
    %90 = arith.sitofp %89 : vector<12x128xi32> to vector<12x128xf32>
    %91 = arith.addf %72, %90 : vector<12x128xf32>
    %c67110476_i32 = arith.constant 67110476 : i32
    %92 = vector.broadcast %c67110476_i32 : i32 to vector<12x128xi32>
    %93 = arith.addi %14, %92 : vector<12x128xi32>
    %c16_i32_19 = arith.constant 16 : i32
    %94 = vector.broadcast %c16_i32_19 : i32 to vector<12x128xi32>
    %95 = arith.shrsi %93, %94 : vector<12x128xi32>
    %96 = arith.xori %93, %95 : vector<12x128xi32>
    %c2146121773_i32_20 = arith.constant 2146121773 : i32
    %97 = vector.broadcast %c2146121773_i32_20 : i32 to vector<12x128xi32>
    %98 = arith.muli %96, %97 : vector<12x128xi32>
    %c15_i32_21 = arith.constant 15 : i32
    %99 = vector.broadcast %c15_i32_21 : i32 to vector<12x128xi32>
    %100 = arith.shrsi %98, %99 : vector<12x128xi32>
    %101 = arith.xori %98, %100 : vector<12x128xi32>
    %c-2073179509_i32_22 = arith.constant -2073179509 : i32
    %102 = vector.broadcast %c-2073179509_i32_22 : i32 to vector<12x128xi32>
    %103 = arith.muli %101, %102 : vector<12x128xi32>
    %c16_i32_23 = arith.constant 16 : i32
    %104 = vector.broadcast %c16_i32_23 : i32 to vector<12x128xi32>
    %105 = arith.shrsi %103, %104 : vector<12x128xi32>
    %106 = arith.xori %103, %105 : vector<12x128xi32>
    %c8388607_i32_24 = arith.constant 8388607 : i32
    %107 = vector.broadcast %c8388607_i32_24 : i32 to vector<12x128xi32>
    %108 = arith.andi %106, %107 : vector<12x128xi32>
    %109 = arith.sitofp %108 : vector<12x128xi32> to vector<12x128xf32>
    %110 = arith.addf %91, %109 : vector<12x128xf32>
    %c83888095_i32 = arith.constant 83888095 : i32
    %111 = vector.broadcast %c83888095_i32 : i32 to vector<12x128xi32>
    %112 = arith.addi %14, %111 : vector<12x128xi32>
    %c16_i32_25 = arith.constant 16 : i32
    %113 = vector.broadcast %c16_i32_25 : i32 to vector<12x128xi32>
    %114 = arith.shrsi %112, %113 : vector<12x128xi32>
    %115 = arith.xori %112, %114 : vector<12x128xi32>
    %c2146121773_i32_26 = arith.constant 2146121773 : i32
    %116 = vector.broadcast %c2146121773_i32_26 : i32 to vector<12x128xi32>
    %117 = arith.muli %115, %116 : vector<12x128xi32>
    %c15_i32_27 = arith.constant 15 : i32
    %118 = vector.broadcast %c15_i32_27 : i32 to vector<12x128xi32>
    %119 = arith.shrsi %117, %118 : vector<12x128xi32>
    %120 = arith.xori %117, %119 : vector<12x128xi32>
    %c-2073179509_i32_28 = arith.constant -2073179509 : i32
    %121 = vector.broadcast %c-2073179509_i32_28 : i32 to vector<12x128xi32>
    %122 = arith.muli %120, %121 : vector<12x128xi32>
    %c16_i32_29 = arith.constant 16 : i32
    %123 = vector.broadcast %c16_i32_29 : i32 to vector<12x128xi32>
    %124 = arith.shrsi %122, %123 : vector<12x128xi32>
    %125 = arith.xori %122, %124 : vector<12x128xi32>
    %c8388607_i32_30 = arith.constant 8388607 : i32
    %126 = vector.broadcast %c8388607_i32_30 : i32 to vector<12x128xi32>
    %127 = arith.andi %125, %126 : vector<12x128xi32>
    %128 = arith.sitofp %127 : vector<12x128xi32> to vector<12x128xf32>
    %129 = arith.addf %110, %128 : vector<12x128xf32>
    %c100665714_i32 = arith.constant 100665714 : i32
    %130 = vector.broadcast %c100665714_i32 : i32 to vector<12x128xi32>
    %131 = arith.addi %14, %130 : vector<12x128xi32>
    %c16_i32_31 = arith.constant 16 : i32
    %132 = vector.broadcast %c16_i32_31 : i32 to vector<12x128xi32>
    %133 = arith.shrsi %131, %132 : vector<12x128xi32>
    %134 = arith.xori %131, %133 : vector<12x128xi32>
    %c2146121773_i32_32 = arith.constant 2146121773 : i32
    %135 = vector.broadcast %c2146121773_i32_32 : i32 to vector<12x128xi32>
    %136 = arith.muli %134, %135 : vector<12x128xi32>
    %c15_i32_33 = arith.constant 15 : i32
    %137 = vector.broadcast %c15_i32_33 : i32 to vector<12x128xi32>
    %138 = arith.shrsi %136, %137 : vector<12x128xi32>
    %139 = arith.xori %136, %138 : vector<12x128xi32>
    %c-2073179509_i32_34 = arith.constant -2073179509 : i32
    %140 = vector.broadcast %c-2073179509_i32_34 : i32 to vector<12x128xi32>
    %141 = arith.muli %139, %140 : vector<12x128xi32>
    %c16_i32_35 = arith.constant 16 : i32
    %142 = vector.broadcast %c16_i32_35 : i32 to vector<12x128xi32>
    %143 = arith.shrsi %141, %142 : vector<12x128xi32>
    %144 = arith.xori %141, %143 : vector<12x128xi32>
    %c8388607_i32_36 = arith.constant 8388607 : i32
    %145 = vector.broadcast %c8388607_i32_36 : i32 to vector<12x128xi32>
    %146 = arith.andi %144, %145 : vector<12x128xi32>
    %147 = arith.sitofp %146 : vector<12x128xi32> to vector<12x128xf32>
    %148 = arith.addf %129, %147 : vector<12x128xf32>
    %c117443333_i32 = arith.constant 117443333 : i32
    %149 = vector.broadcast %c117443333_i32 : i32 to vector<12x128xi32>
    %150 = arith.addi %14, %149 : vector<12x128xi32>
    %c16_i32_37 = arith.constant 16 : i32
    %151 = vector.broadcast %c16_i32_37 : i32 to vector<12x128xi32>
    %152 = arith.shrsi %150, %151 : vector<12x128xi32>
    %153 = arith.xori %150, %152 : vector<12x128xi32>
    %c2146121773_i32_38 = arith.constant 2146121773 : i32
    %154 = vector.broadcast %c2146121773_i32_38 : i32 to vector<12x128xi32>
    %155 = arith.muli %153, %154 : vector<12x128xi32>
    %c15_i32_39 = arith.constant 15 : i32
    %156 = vector.broadcast %c15_i32_39 : i32 to vector<12x128xi32>
    %157 = arith.shrsi %155, %156 : vector<12x128xi32>
    %158 = arith.xori %155, %157 : vector<12x128xi32>
    %c-2073179509_i32_40 = arith.constant -2073179509 : i32
    %159 = vector.broadcast %c-2073179509_i32_40 : i32 to vector<12x128xi32>
    %160 = arith.muli %158, %159 : vector<12x128xi32>
    %c16_i32_41 = arith.constant 16 : i32
    %161 = vector.broadcast %c16_i32_41 : i32 to vector<12x128xi32>
    %162 = arith.shrsi %160, %161 : vector<12x128xi32>
    %163 = arith.xori %160, %162 : vector<12x128xi32>
    %c8388607_i32_42 = arith.constant 8388607 : i32
    %164 = vector.broadcast %c8388607_i32_42 : i32 to vector<12x128xi32>
    %165 = arith.andi %163, %164 : vector<12x128xi32>
    %166 = arith.sitofp %165 : vector<12x128xi32> to vector<12x128xf32>
    %167 = arith.addf %148, %166 : vector<12x128xf32>
    %c134220952_i32 = arith.constant 134220952 : i32
    %168 = vector.broadcast %c134220952_i32 : i32 to vector<12x128xi32>
    %169 = arith.addi %14, %168 : vector<12x128xi32>
    %c16_i32_43 = arith.constant 16 : i32
    %170 = vector.broadcast %c16_i32_43 : i32 to vector<12x128xi32>
    %171 = arith.shrsi %169, %170 : vector<12x128xi32>
    %172 = arith.xori %169, %171 : vector<12x128xi32>
    %c2146121773_i32_44 = arith.constant 2146121773 : i32
    %173 = vector.broadcast %c2146121773_i32_44 : i32 to vector<12x128xi32>
    %174 = arith.muli %172, %173 : vector<12x128xi32>
    %c15_i32_45 = arith.constant 15 : i32
    %175 = vector.broadcast %c15_i32_45 : i32 to vector<12x128xi32>
    %176 = arith.shrsi %174, %175 : vector<12x128xi32>
    %177 = arith.xori %174, %176 : vector<12x128xi32>
    %c-2073179509_i32_46 = arith.constant -2073179509 : i32
    %178 = vector.broadcast %c-2073179509_i32_46 : i32 to vector<12x128xi32>
    %179 = arith.muli %177, %178 : vector<12x128xi32>
    %c16_i32_47 = arith.constant 16 : i32
    %180 = vector.broadcast %c16_i32_47 : i32 to vector<12x128xi32>
    %181 = arith.shrsi %179, %180 : vector<12x128xi32>
    %182 = arith.xori %179, %181 : vector<12x128xi32>
    %c8388607_i32_48 = arith.constant 8388607 : i32
    %183 = vector.broadcast %c8388607_i32_48 : i32 to vector<12x128xi32>
    %184 = arith.andi %182, %183 : vector<12x128xi32>
    %185 = arith.sitofp %184 : vector<12x128xi32> to vector<12x128xf32>
    %186 = arith.addf %167, %185 : vector<12x128xf32>
    %c150998571_i32 = arith.constant 150998571 : i32
    %187 = vector.broadcast %c150998571_i32 : i32 to vector<12x128xi32>
    %188 = arith.addi %14, %187 : vector<12x128xi32>
    %c16_i32_49 = arith.constant 16 : i32
    %189 = vector.broadcast %c16_i32_49 : i32 to vector<12x128xi32>
    %190 = arith.shrsi %188, %189 : vector<12x128xi32>
    %191 = arith.xori %188, %190 : vector<12x128xi32>
    %c2146121773_i32_50 = arith.constant 2146121773 : i32
    %192 = vector.broadcast %c2146121773_i32_50 : i32 to vector<12x128xi32>
    %193 = arith.muli %191, %192 : vector<12x128xi32>
    %c15_i32_51 = arith.constant 15 : i32
    %194 = vector.broadcast %c15_i32_51 : i32 to vector<12x128xi32>
    %195 = arith.shrsi %193, %194 : vector<12x128xi32>
    %196 = arith.xori %193, %195 : vector<12x128xi32>
    %c-2073179509_i32_52 = arith.constant -2073179509 : i32
    %197 = vector.broadcast %c-2073179509_i32_52 : i32 to vector<12x128xi32>
    %198 = arith.muli %196, %197 : vector<12x128xi32>
    %c16_i32_53 = arith.constant 16 : i32
    %199 = vector.broadcast %c16_i32_53 : i32 to vector<12x128xi32>
    %200 = arith.shrsi %198, %199 : vector<12x128xi32>
    %201 = arith.xori %198, %200 : vector<12x128xi32>
    %c8388607_i32_54 = arith.constant 8388607 : i32
    %202 = vector.broadcast %c8388607_i32_54 : i32 to vector<12x128xi32>
    %203 = arith.andi %201, %202 : vector<12x128xi32>
    %204 = arith.sitofp %203 : vector<12x128xi32> to vector<12x128xf32>
    %205 = arith.addf %186, %204 : vector<12x128xf32>
    %c167776190_i32 = arith.constant 167776190 : i32
    %206 = vector.broadcast %c167776190_i32 : i32 to vector<12x128xi32>
    %207 = arith.addi %14, %206 : vector<12x128xi32>
    %c16_i32_55 = arith.constant 16 : i32
    %208 = vector.broadcast %c16_i32_55 : i32 to vector<12x128xi32>
    %209 = arith.shrsi %207, %208 : vector<12x128xi32>
    %210 = arith.xori %207, %209 : vector<12x128xi32>
    %c2146121773_i32_56 = arith.constant 2146121773 : i32
    %211 = vector.broadcast %c2146121773_i32_56 : i32 to vector<12x128xi32>
    %212 = arith.muli %210, %211 : vector<12x128xi32>
    %c15_i32_57 = arith.constant 15 : i32
    %213 = vector.broadcast %c15_i32_57 : i32 to vector<12x128xi32>
    %214 = arith.shrsi %212, %213 : vector<12x128xi32>
    %215 = arith.xori %212, %214 : vector<12x128xi32>
    %c-2073179509_i32_58 = arith.constant -2073179509 : i32
    %216 = vector.broadcast %c-2073179509_i32_58 : i32 to vector<12x128xi32>
    %217 = arith.muli %215, %216 : vector<12x128xi32>
    %c16_i32_59 = arith.constant 16 : i32
    %218 = vector.broadcast %c16_i32_59 : i32 to vector<12x128xi32>
    %219 = arith.shrsi %217, %218 : vector<12x128xi32>
    %220 = arith.xori %217, %219 : vector<12x128xi32>
    %c8388607_i32_60 = arith.constant 8388607 : i32
    %221 = vector.broadcast %c8388607_i32_60 : i32 to vector<12x128xi32>
    %222 = arith.andi %220, %221 : vector<12x128xi32>
    %223 = arith.sitofp %222 : vector<12x128xi32> to vector<12x128xf32>
    %224 = arith.addf %205, %223 : vector<12x128xf32>
    %c184553809_i32 = arith.constant 184553809 : i32
    %225 = vector.broadcast %c184553809_i32 : i32 to vector<12x128xi32>
    %226 = arith.addi %14, %225 : vector<12x128xi32>
    %c16_i32_61 = arith.constant 16 : i32
    %227 = vector.broadcast %c16_i32_61 : i32 to vector<12x128xi32>
    %228 = arith.shrsi %226, %227 : vector<12x128xi32>
    %229 = arith.xori %226, %228 : vector<12x128xi32>
    %c2146121773_i32_62 = arith.constant 2146121773 : i32
    %230 = vector.broadcast %c2146121773_i32_62 : i32 to vector<12x128xi32>
    %231 = arith.muli %229, %230 : vector<12x128xi32>
    %c15_i32_63 = arith.constant 15 : i32
    %232 = vector.broadcast %c15_i32_63 : i32 to vector<12x128xi32>
    %233 = arith.shrsi %231, %232 : vector<12x128xi32>
    %234 = arith.xori %231, %233 : vector<12x128xi32>
    %c-2073179509_i32_64 = arith.constant -2073179509 : i32
    %235 = vector.broadcast %c-2073179509_i32_64 : i32 to vector<12x128xi32>
    %236 = arith.muli %234, %235 : vector<12x128xi32>
    %c16_i32_65 = arith.constant 16 : i32
    %237 = vector.broadcast %c16_i32_65 : i32 to vector<12x128xi32>
    %238 = arith.shrsi %236, %237 : vector<12x128xi32>
    %239 = arith.xori %236, %238 : vector<12x128xi32>
    %c8388607_i32_66 = arith.constant 8388607 : i32
    %240 = vector.broadcast %c8388607_i32_66 : i32 to vector<12x128xi32>
    %241 = arith.andi %239, %240 : vector<12x128xi32>
    %242 = arith.sitofp %241 : vector<12x128xi32> to vector<12x128xf32>
    %243 = arith.addf %224, %242 : vector<12x128xf32>
    %cst_67 = arith.constant 1.1920929E-7 : f32
    %244 = vector.broadcast %cst_67 : f32 to vector<12x128xf32>
    %245 = arith.mulf %243, %244 : vector<12x128xf32>
    %cst_68 = arith.constant 6.000000e+00 : f32
    %246 = vector.broadcast %cst_68 : f32 to vector<12x128xf32>
    %247 = arith.subf %245, %246 : vector<12x128xf32>
    %cst_69 = arith.constant 1.000000e-01 : f32
    %248 = vector.broadcast %cst_69 : f32 to vector<12x128xf32>
    %249 = arith.mulf %247, %248 : vector<12x128xf32>
    %c0_70 = arith.constant 0 : index
    %c0_71 = arith.constant 0 : index
    %250 = vector.load %arg2[%c0_70, %c0_71] : memref<12x128xf32, #tpu.memory_space<vmem>>, vector<12x128xf32>
    %251 = arith.addf %250, %249 : vector<12x128xf32>
    %c0_72 = arith.constant 0 : index
    %c0_73 = arith.constant 0 : index
    %252 = vector.load %arg3[%c0_72, %c0_73] : memref<12x128xf32, #tpu.memory_space<vmem>>, vector<12x128xf32>
    tpu.vector_store %arg3[%c0_72, %c0_73], %251 {strides = array<i32>} : memref<12x128xf32, #tpu.memory_space<vmem>>, vector<12x128xf32>,
    return
  }
  func.func @transform_0(%arg0: i32) -> i32 {
    %c0_i32 = arith.constant 0 : i32
    %c0_i32_0 = arith.constant 0 : i32
    return %c0_i32 : i32
  }
  func.func @transform_1(%arg0: i32) -> (i32, i32) {
    %c0_i32 = arith.constant 0 : i32
    %c0_i32_0 = arith.constant 0 : i32
    return %arg0, %c0_i32 : i32, i32
  }
  func.func @transform_2(%arg0: i32) -> (i32, i32) {
    %c0_i32 = arith.constant 0 : i32
    %c0_i32_0 = arith.constant 0 : i32
    return %arg0, %c0_i32 : i32, i32
  }
}

</mosaic_0001>

<bundles_post_ra>
// kernel: tpu_custom_call.1
= control target key start
LH: loop header
LB: loop body
LE: loop exit
PB: predicated region body
PF: predicated region fallthrough
CT: control target
= control target key end

     0   :  { %8 = vsyncpa [#allocation4], 0  ;;  %s500_s0 = inlined_call_operand.<no memory space> [shape: s32[1], index: 0, kind: input, shape index: {}]   ;;  %s501_s1 = inlined_call_operand.hbm [shape: f32[12,128], index: 1, kind: input, shape index: {}]   ;;  %s502_s2 = inlined_call_operand.hbm [shape: f32[12,128], index: 2, kind: output, shape index: {}]  }
   0x1   :  { %9 = vsyncpa [#allocation5], 0  ;;  %s16_s11 = sshll.u32 %s501_s1, 4  ;;  %s425_s12 = smov [#allocation3]   ;;  %s17_s11 = int_to_ptr.hbm [resolvable:$true] %s16_s11 }
   0x2   :  { %s18_s13 = sshll.u32 %s425_s12, 4  ;;  %s426_s14 = smov 128   ;;  %s19_s13 = int_to_ptr.vmem [resolvable:$true] %s18_s13 }
   0x3   :  { %s427_s15 = smov 8  }
   0x4   :  { %24 = dma.hbm_to_vmem [thread:$0]  %s17_s11, 256, %s19_s13, [#allocation4], %s426_s14, %s426_s14, %s427_s15  }
   0x5   :  { %421 = dma.done.wait [#allocation4], 256  }
   0x6   :  { %422 = vsyncadd [#allocation4], 4294967040  ;;  %v29_v0 = vlaneseq  ;;  %s45_s18 = sadd.s32 24301, %s500_s0  ;;  %s428_s0 = smov [#allocation6]  }
   0x7   :  { %s46_s1 = smul.u32 374761393, %s45_s18  ;;  %s352_s19 = sshll.u32 %s428_s0, 4  ;;  %s353_s19 = int_to_ptr.vmem [resolvable:$true] %s352_s19 }
   0x8   :  { %v30_v1 = vshrl.u32 %v29_v0, 7  ;;  %v37_v2 = vand.u32 127, %v29_v0  ;;  %s354_s22 = sshll.u32 %s502_s2, 4  ;;  %s355_s22 = int_to_ptr.hbm [resolvable:$true] %s354_s22 }
   0x9   :  { %v47_v7 = vstv %s46_s1 }
   0xa   :  { %v31_v3 = vadd.s32 8, %v30_v1  ;;  %v38_v4 = vmul.u32 128, %v30_v1 }
   0xc   :  { %v39_v5 = vmul.u32 128, %v31_v3  ;;  %v40_v6 = vadd.s32 %v38_v4, %v37_v2 }
   0xe   :  { %v41_v8 = vadd.s32 %v39_v5, %v37_v2  ;;  %v43_v9 = vmul.u32 2654435769, %v40_v6 }
  0x10   :  { %v44_v10 = vmul.u32 2654435769, %v41_v8  ;;  %v453_v11 = vadd.s32 %v47_v7, %v43_v9 }
  0x12   :  { %v455_v12 = vadd.s32 %v47_v7, %v44_v10  ;;  %v50_v13 = vshra.s32 %v453_v11, 16  ;;  %v72_v14 = vadd.s32 16777619, %v453_v11  ;;  %v96_v15 = vadd.s32 33555238, %v453_v11 }
  0x13   :  { %v120_v16 = vadd.s32 50332857, %v453_v11  ;;  %v462_v17 = vadd.s32 67110476, %v453_v11  ;;  %v465_v18 = vadd.s32 83888095, %v453_v11 }
  0x14   :  { %v51_v19 = vshra.s32 %v455_v12, 16  ;;  %v52_v20 = vxor.u32 %v50_v13, %v453_v11  ;;  %v73_v21 = vadd.s32 16777619, %v455_v12  ;;  %v74_v22 = vshra.s32 %v72_v14, 16 }
  0x15   :  { %v97_v23 = vadd.s32 33555238, %v455_v12  ;;  %v98_v24 = vshra.s32 %v96_v15, 16  ;;  %v121_v25 = vadd.s32 50332857, %v455_v12  ;;  %v122_v26 = vshra.s32 %v120_v16, 16 }
  0x16   :  { %v53_v27 = vxor.u32 %v51_v19, %v455_v12  ;;  %v54_v28 = vmul.u32 2146121773, %v52_v20  ;;  %v75_v29 = vshra.s32 %v73_v21, 16  ;;  %v76_v30 = vxor.u32 %v74_v22, %v72_v14 }
  0x17   :  { %v99_v31 = vshra.s32 %v97_v23, 16  ;;  %v100_v32 = vxor.u32 %v98_v24, %v96_v15  ;;  %v123_v33 = vshra.s32 %v121_v25, 16  ;;  %v124_v34 = vxor.u32 %v122_v26, %v120_v16 }
  0x18   :  { %v55_v35 = vmul.u32 2146121773, %v53_v27  ;;  %v56_v36 = vshra.s32 %v54_v28, 15  ;;  %v77_v37 = vxor.u32 %v75_v29, %v73_v21  ;;  %v78_v38 = vmul.u32 2146121773, %v76_v30 }
  0x19   :  { %v101_v39 = vxor.u32 %v99_v31, %v97_v23  ;;  %v102_v40 = vmul.u32 2146121773, %v100_v32  ;;  %v125_v41 = vxor.u32 %v123_v33, %v121_v25  ;;  %v126_v42 = vmul.u32 2146121773, %v124_v34 }
  0x1a   :  { %v57_v43 = vshra.s32 %v55_v35, 15  ;;  %v58_v44 = vxor.u32 %v56_v36, %v54_v28  ;;  %v79_v45 = vmul.u32 2146121773, %v77_v37  ;;  %v80_v46 = vshra.s32 %v78_v38, 15 }
  0x1b   :  { %v103_v47 = vmul.u32 2146121773, %v101_v39  ;;  %v104_v48 = vshra.s32 %v102_v40, 15  ;;  %v127_v49 = vmul.u32 2146121773, %v125_v41  ;;  %v128_v50 = vshra.s32 %v126_v42, 15 }
  0x1c   :  { %v59_v51 = vxor.u32 %v57_v43, %v55_v35  ;;  %v60_v52 = vmul.u32 2221787787, %v58_v44  ;;  %v81_v53 = vshra.s32 %v79_v45, 15  ;;  %v82_v54 = vxor.u32 %v80_v46, %v78_v38 }
  0x1d   :  { %v105_v55 = vshra.s32 %v103_v47, 15  ;;  %v106_v56 = vxor.u32 %v104_v48, %v102_v40  ;;  %v129_v57 = vshra.s32 %v127_v49, 15  ;;  %v130_v58 = vxor.u32 %v128_v50, %v126_v42 }
  0x1e   :  { %v61_v59 = vmul.u32 2221787787, %v59_v51  ;;  %v62_v60 = vshra.s32 %v60_v52, 16  ;;  %v83_v61 = vxor.u32 %v81_v53, %v79_v45  ;;  %v84_v62 = vmul.u32 2221787787, %v82_v54 }
  0x1f   :  { %v107_v63 = vxor.u32 %v105_v55, %v103_v47  ;;  %v108_v0 = vmul.u32 2221787787, %v106_v56  ;;  %v131_v1 = vxor.u32 %v129_v57, %v127_v49  ;;  %v132_v2 = vmul.u32 2221787787, %v130_v58 }
  0x20   :  { %v63_v3 = vshra.s32 %v61_v59, 16  ;;  %v64_v4 = vxor.u32 %v62_v60, %v60_v52  ;;  %v85_v5 = vmul.u32 2221787787, %v83_v61  ;;  %v86_v6 = vshra.s32 %v84_v62, 16 }
  0x21   :  { %v109_v7 = vmul.u32 2221787787, %v107_v63  ;;  %v110_v8 = vshra.s32 %v108_v0, 16  ;;  %v133_v9 = vmul.u32 2221787787, %v131_v1  ;;  %v134_v10 = vshra.s32 %v132_v2, 16 }
  0x22   :  { %v65_v13 = vxor.u32 %v63_v3, %v61_v59  ;;  %v66_v14 = vand.u32 8388607, %v64_v4  ;;  %v87_v15 = vshra.s32 %v85_v5, 16  ;;  %v88_v16 = vxor.u32 %v86_v6, %v84_v62 }
  0x23   :  { %v111_v19 = vshra.s32 %v109_v7, 16  ;;  %v112_v20 = vxor.u32 %v110_v8, %v108_v0  ;;  %v135_v21 = vshra.s32 %v133_v9, 16  ;;  %v136_v22 = vxor.u32 %v134_v10, %v132_v2 }
  0x24   :  { %v67_v23 = vand.u32 8388607, %v65_v13  ;;  %v68_v24 = vcvt.s32.f32 %v66_v14  ;;  %v89_v25 = vxor.u32 %v87_v15, %v85_v5  ;;  %v90_v26 = vand.u32 8388607, %v88_v16 }
  0x25   :  { %v113_v27 = vxor.u32 %v111_v19, %v109_v7  ;;  %v114_v28 = vand.u32 8388607, %v112_v20  ;;  %v137_v29 = vxor.u32 %v135_v21, %v133_v9  ;;  %v138_v30 = vand.u32 8388607, %v136_v22 }
  0x26   :  { %v69_v31 = vcvt.s32.f32 %v67_v23  ;;  %v91_v32 = vand.u32 8388607, %v89_v25  ;;  %v92_v33 = vcvt.s32.f32 %v90_v26  ;;  %v145_v34 = vadd.s32 67110476, %v455_v12 }
  0x27   :  { %v115_v35 = vand.u32 8388607, %v113_v27  ;;  %v116_v36 = vcvt.s32.f32 %v114_v28  ;;  %v139_v37 = vand.u32 8388607, %v137_v29  ;;  %v140_v38 = vcvt.s32.f32 %v138_v30 }
  0x28   :  { %v93_v39 = vcvt.s32.f32 %v91_v32  ;;  %v94_v40 = vadd.f32 %v92_v33, %v68_v24  ;;  %v146_v41 = vshra.s32 %v462_v17, 16  ;;  %v147_v42 = vshra.s32 %v145_v34, 16 }
  0x29   :  { %v117_v43 = vcvt.s32.f32 %v115_v35  ;;  %v141_v44 = vcvt.s32.f32 %v139_v37  ;;  %v169_v45 = vadd.s32 83888095, %v455_v12  ;;  %v170_v46 = vshra.s32 %v465_v18, 16 }
  0x2a   :  { %v95_v47 = vadd.f32 %v93_v39, %v69_v31  ;;  %v118_v48 = vadd.f32 %v116_v36, %v94_v40  ;;  %v148_v49 = vxor.u32 %v146_v41, %v462_v17  ;;  %v149_v50 = vxor.u32 %v147_v42, %v145_v34 }
  0x2b   :  { %v171_v51 = vshra.s32 %v169_v45, 16  ;;  %v172_v52 = vxor.u32 %v170_v46, %v465_v18  ;;  %v192_v53 = vadd.s32 100665714, %v453_v11  ;;  %v193_v54 = vadd.s32 100665714, %v455_v12 }
  0x2c   :  { %v119_v55 = vadd.f32 %v117_v43, %v95_v47  ;;  %v481_v56 = vadd.f32 %v140_v38, %v118_v48  ;;  %v150_v57 = vmul.u32 2146121773, %v148_v49  ;;  %v151_v58 = vmul.u32 2146121773, %v149_v50 }
  0x2d   :  { %v173_v59 = vxor.u32 %v171_v51, %v169_v45  ;;  %v174_v60 = vmul.u32 2146121773, %v172_v52  ;;  %v194_v61 = vshra.s32 %v192_v53, 16  ;;  %v195_v62 = vshra.s32 %v193_v54, 16 }
  0x2e   :  { %v143_v63 = vadd.f32 %v141_v44, %v119_v55  ;;  %v152_v0 = vshra.s32 %v150_v57, 15  ;;  %v153_v17 = vshra.s32 %v151_v58, 15  ;;  %v216_v1 = vadd.s32 117443333, %v453_v11 }
  0x2f   :  { %v175_v2 = vmul.u32 2146121773, %v173_v59  ;;  %v176_v18 = vshra.s32 %v174_v60, 15  ;;  %v196_v3 = vxor.u32 %v194_v61, %v192_v53  ;;  %v197_v4 = vxor.u32 %v195_v62, %v193_v54 }
  0x30   :  { %v154_v5 = vxor.u32 %v152_v0, %v150_v57  ;;  %v155_v6 = vxor.u32 %v153_v17, %v151_v58  ;;  %v217_v7 = vadd.s32 117443333, %v455_v12  ;;  %v218_v8 = vshra.s32 %v216_v1, 16 }
  0x31   :  { %v177_v9 = vshra.s32 %v175_v2, 15  ;;  %v178_v10 = vxor.u32 %v176_v18, %v174_v60  ;;  %v198_v13 = vmul.u32 2146121773, %v196_v3  ;;  %v199_v14 = vmul.u32 2146121773, %v197_v4 }
  0x32   :  { %v156_v15 = vmul.u32 2221787787, %v154_v5  ;;  %v157_v16 = vmul.u32 2221787787, %v155_v6  ;;  %v219_v19 = vshra.s32 %v217_v7, 16  ;;  %v220_v20 = vxor.u32 %v218_v8, %v216_v1 }
  0x33   :  { %v179_v21 = vxor.u32 %v177_v9, %v175_v2  ;;  %v180_v22 = vmul.u32 2221787787, %v178_v10  ;;  %v200_v23 = vshra.s32 %v198_v13, 15  ;;  %v201_v24 = vshra.s32 %v199_v14, 15 }
  0x34   :  { %v158_v25 = vshra.s32 %v156_v15, 16  ;;  %v159_v26 = vshra.s32 %v157_v16, 16  ;;  %v221_v27 = vxor.u32 %v219_v19, %v217_v7  ;;  %v222_v28 = vmul.u32 2146121773, %v220_v20 }
  0x35   :  { %v181_v29 = vmul.u32 2221787787, %v179_v21  ;;  %v182_v30 = vshra.s32 %v180_v22, 16  ;;  %v202_v31 = vxor.u32 %v200_v23, %v198_v13  ;;  %v203_v32 = vxor.u32 %v201_v24, %v199_v14 }
  0x36   :  { %v160_v33 = vxor.u32 %v158_v25, %v156_v15  ;;  %v161_v34 = vxor.u32 %v159_v26, %v157_v16  ;;  %v223_v35 = vmul.u32 2146121773, %v221_v27  ;;  %v224_v36 = vshra.s32 %v222_v28, 15 }
  0x37   :  { %v183_v37 = vshra.s32 %v181_v29, 16  ;;  %v184_v38 = vxor.u32 %v182_v30, %v180_v22  ;;  %v204_v39 = vmul.u32 2221787787, %v202_v31  ;;  %v205_v40 = vmul.u32 2221787787, %v203_v32 }
  0x38   :  { %v162_v41 = vand.u32 8388607, %v160_v33  ;;  %v163_v42 = vand.u32 8388607, %v161_v34  ;;  %v225_v43 = vshra.s32 %v223_v35, 15  ;;  %v226_v44 = vxor.u32 %v224_v36, %v222_v28 }
  0x39   :  { %v185_v45 = vxor.u32 %v183_v37, %v181_v29  ;;  %v186_v46 = vand.u32 8388607, %v184_v38  ;;  %v206_v47 = vshra.s32 %v204_v39, 16  ;;  %v207_v48 = vshra.s32 %v205_v40, 16 }
  0x3a   :  { %v164_v49 = vcvt.s32.f32 %v162_v41  ;;  %v165_v50 = vcvt.s32.f32 %v163_v42  ;;  %v227_v51 = vxor.u32 %v225_v43, %v223_v35  ;;  %v228_v52 = vmul.u32 2221787787, %v226_v44 }
  0x3b   :  { %v187_v53 = vand.u32 8388607, %v185_v45  ;;  %v188_v54 = vcvt.s32.f32 %v186_v46  ;;  %v208_v55 = vxor.u32 %v206_v47, %v204_v39  ;;  %v209_v57 = vxor.u32 %v207_v48, %v205_v40 }
  0x3c   :  { %v166_v58 = vadd.f32 %v164_v49, %v481_v56  ;;  %v167_v59 = vadd.f32 %v165_v50, %v143_v63  ;;  %v229_v60 = vmul.u32 2221787787, %v227_v51  ;;  %v230_v61 = vshra.s32 %v228_v52, 16 }
  0x3d   :  { %v189_v62 = vcvt.s32.f32 %v187_v53  ;;  %v210_v0 = vand.u32 8388607, %v208_v55  ;;  %v211_v17 = vand.u32 8388607, %v209_v57  ;;  %v240_v1 = vadd.s32 134220952, %v453_v11 }
  0x3e   :  { %v190_v2 = vadd.f32 %v188_v54, %v166_v58  ;;  %v231_v18 = vshra.s32 %v229_v60, 16  ;;  %v232_v3 = vxor.u32 %v230_v61, %v228_v52  ;;  %v241_v4 = vadd.s32 134220952, %v455_v12 }
  0x3f   :  { %v191_v5 = vadd.f32 %v189_v62, %v167_v59  ;;  %v212_v6 = vcvt.s32.f32 %v210_v0  ;;  %v213_v7 = vcvt.s32.f32 %v211_v17  ;;  %v242_v8 = vshra.s32 %v240_v1, 16 }
  0x40   :  { %v233_v9 = vxor.u32 %v231_v18, %v229_v60  ;;  %v234_v10 = vand.u32 8388607, %v232_v3  ;;  %v243_v56 = vshra.s32 %v241_v4, 16  ;;  %v264_v63 = vadd.s32 150998571, %v453_v11 }
  0x41   :  { %v214_v13 = vadd.f32 %v212_v6, %v190_v2  ;;  %v215_v14 = vadd.f32 %v213_v7, %v191_v5  ;;  %v244_v15 = vxor.u32 %v242_v8, %v240_v1  ;;  %v265_v16 = vadd.s32 150998571, %v455_v12 }
  0x42   :  { %v235_v19 = vand.u32 8388607, %v233_v9  ;;  %v236_v20 = vcvt.s32.f32 %v234_v10  ;;  %v245_v21 = vxor.u32 %v243_v56, %v241_v4  ;;  %v266_v22 = vshra.s32 %v264_v63, 16 }
  0x43   :  { %v246_v23 = vmul.u32 2146121773, %v244_v15  ;;  %v267_v24 = vshra.s32 %v265_v16, 16  ;;  %v288_v25 = vadd.s32 167776190, %v453_v11 }
  0x44   :  { %v237_v26 = vcvt.s32.f32 %v235_v19  ;;  %v238_v27 = vadd.f32 %v236_v20, %v214_v13  ;;  %v247_v28 = vmul.u32 2146121773, %v245_v21  ;;  %v268_v29 = vxor.u32 %v266_v22, %v264_v63 }
  0x45   :  { %v248_v30 = vshra.s32 %v246_v23, 15  ;;  %v269_v31 = vxor.u32 %v267_v24, %v265_v16  ;;  %v289_v32 = vadd.s32 167776190, %v455_v12  ;;  %v290_v33 = vshra.s32 %v288_v25, 16 }
  0x46   :  { %v239_v34 = vadd.f32 %v237_v26, %v215_v14  ;;  %v249_v35 = vshra.s32 %v247_v28, 15  ;;  %v270_v36 = vmul.u32 2146121773, %v268_v29  ;;  %v312_v37 = vadd.s32 184553809, %v453_v11 }
  0x47   :  { %v250_v38 = vxor.u32 %v248_v30, %v246_v23  ;;  %v271_v39 = vmul.u32 2146121773, %v269_v31  ;;  %v291_v40 = vshra.s32 %v289_v32, 16  ;;  %v292_v41 = vxor.u32 %v290_v33, %v288_v25 }
  0x48   :  { %v251_v42 = vxor.u32 %v249_v35, %v247_v28  ;;  %v272_v43 = vshra.s32 %v270_v36, 15  ;;  %v313_v44 = vadd.s32 184553809, %v455_v12  ;;  %v314_v45 = vshra.s32 %v312_v37, 16 }
  0x49   :  { %v252_v46 = vmul.u32 2221787787, %v250_v38  ;;  %v273_v47 = vshra.s32 %v271_v39, 15  ;;  %v293_v48 = vxor.u32 %v291_v40, %v289_v32  ;;  %v294_v49 = vmul.u32 2146121773, %v292_v41 }
  0x4a   :  { %v253_v50 = vmul.u32 2221787787, %v251_v42  ;;  %v274_v51 = vxor.u32 %v272_v43, %v270_v36  ;;  %v315_v52 = vshra.s32 %v313_v44, 16  ;;  %v316_v53 = vxor.u32 %v314_v45, %v312_v37 }
  0x4b   :  { %v254_v54 = vshra.s32 %v252_v46, 16  ;;  %v275_v55 = vxor.u32 %v273_v47, %v271_v39  ;;  %v295_v11 = vmul.u32 2146121773, %v293_v48  ;;  %v296_v57 = vshra.s32 %v294_v49, 15 }
  0x4c   :  { %v255_v58 = vshra.s32 %v253_v50, 16  ;;  %v276_v59 = vmul.u32 2221787787, %v274_v51  ;;  %v317_v60 = vxor.u32 %v315_v52, %v313_v44  ;;  %v318_v61 = vmul.u32 2146121773, %v316_v53  ;;  %v342_v52 = vld [vmem:[#allocation3] sm:$0xff] }
  0x4d   :  { %v256_v62 = vxor.u32 %v254_v54, %v252_v46  ;;  %v277_v0 = vmul.u32 2221787787, %v275_v55  ;;  %v297_v12 = vshra.s32 %v295_v11, 15  ;;  %v298_v17 = vxor.u32 %v296_v57, %v294_v49  ;;  %v343_v55 = vld [vmem:[#allocation3 + $0x8] sm:$0xf] }
  0x4e   :  { %v257_v1 = vxor.u32 %v255_v58, %v253_v50  ;;  %v278_v2 = vshra.s32 %v276_v59, 16  ;;  %v319_v18 = vmul.u32 2146121773, %v317_v60  ;;  %v320_v3 = vshra.s32 %v318_v61, 15 }
  0x4f   :  { %v258_v4 = vand.u32 8388607, %v256_v62  ;;  %v279_v5 = vshra.s32 %v277_v0, 16  ;;  %v299_v6 = vxor.u32 %v297_v12, %v295_v11  ;;  %v300_v7 = vmul.u32 2221787787, %v298_v17 }
  0x50   :  { %v259_v8 = vand.u32 8388607, %v257_v1  ;;  %v280_v9 = vxor.u32 %v278_v2, %v276_v59  ;;  %v321_v10 = vshra.s32 %v319_v18, 15  ;;  %v322_v56 = vxor.u32 %v320_v3, %v318_v61 }
  0x51   :  { %v260_v63 = vcvt.s32.f32 %v258_v4  ;;  %v281_v13 = vxor.u32 %v279_v5, %v277_v0  ;;  %v301_v14 = vmul.u32 2221787787, %v299_v6  ;;  %v302_v15 = vshra.s32 %v300_v7, 16 }
  0x52   :  { %v261_v16 = vcvt.s32.f32 %v259_v8  ;;  %v282_v19 = vand.u32 8388607, %v280_v9  ;;  %v323_v20 = vxor.u32 %v321_v10, %v319_v18  ;;  %v324_v21 = vmul.u32 2221787787, %v322_v56 }
  0x53   :  { %v262_v22 = vadd.f32 %v260_v63, %v238_v27  ;;  %v283_v23 = vand.u32 8388607, %v281_v13  ;;  %v303_v24 = vshra.s32 %v301_v14, 16  ;;  %v304_v25 = vxor.u32 %v302_v15, %v300_v7 }
  0x54   :  { %v263_v26 = vadd.f32 %v261_v16, %v239_v34  ;;  %v284_v28 = vcvt.s32.f32 %v282_v19  ;;  %v325_v29 = vmul.u32 2221787787, %v323_v20  ;;  %v326_v30 = vshra.s32 %v324_v21, 16 }
  0x55   :  { %v285_v31 = vcvt.s32.f32 %v283_v23  ;;  %v305_v32 = vxor.u32 %v303_v24, %v301_v14  ;;  %v306_v33 = vand.u32 8388607, %v304_v25 }
  0x56   :  { %v286_v35 = vadd.f32 %v284_v28, %v262_v22  ;;  %v327_v36 = vshra.s32 %v325_v29, 16  ;;  %v328_v37 = vxor.u32 %v326_v30, %v324_v21 }
  0x57   :  { %v287_v38 = vadd.f32 %v285_v31, %v263_v26  ;;  %v307_v39 = vand.u32 8388607, %v305_v32  ;;  %v308_v40 = vcvt.s32.f32 %v306_v33 }
  0x58   :  { %v329_v41 = vxor.u32 %v327_v36, %v325_v29  ;;  %v330_v42 = vand.u32 8388607, %v328_v37 }
  0x59   :  { %v309_v43 = vcvt.s32.f32 %v307_v39  ;;  %v310_v27 = vadd.f32 %v308_v40, %v286_v35 }
  0x5a   :  { %v331_v44 = vand.u32 8388607, %v329_v41  ;;  %v332_v45 = vcvt.s32.f32 %v330_v42 }
  0x5b   :  { %v311_v46 = vadd.f32 %v309_v43, %v287_v38 }
  0x5c   :  { %v333_v34 = vcvt.s32.f32 %v331_v44  ;;  %v334_v47 = vadd.f32 %v332_v45, %v310_v27 }
  0x5e   :  { %v335_v48 = vadd.f32 %v333_v34, %v311_v46  ;;  %v336_v49 = vmul.f32 1.1920929e-07, %v334_v47 }
  0x60   :  { %v337_v50 = vmul.f32 1.1920929e-07, %v335_v48  ;;  %v367_v51 = vadd.f32 -6.0, %v336_v49 }
  0x62   :  { %v368_v53 = vadd.f32 -6.0, %v337_v50  ;;  %v340_v54 = vmul.f32 0.1, %v367_v51 }
  0x64   :  { %v341_v11 = vmul.f32 0.1, %v368_v53  ;;  %v344_v57 = vadd.f32 %v342_v52, %v340_v54 }
  0x66   :  { %v345_v58 = vadd.f32 %v343_v55, %v341_v11  ;;  %346 = vst [vmem:[#allocation6] sm:$0xff] %v344_v57 }
  0x68   :  { %347 = vst [vmem:[#allocation6 + $0x8] sm:$0xf] %v345_v58 }
  0x69   :  { %360 = dma.vmem_to_hbm [thread:$0]  %s353_s19, 256, %s355_s22, [#allocation5], %s426_s14, %s426_s14, %s427_s15  }
  0x6a   :  { %423 = dma.done.wait [#allocation5], 256  }
  0x6b   :  { %424 = vsyncadd [#allocation5], 4294967040 }
  0x6c   :  { %365 = vsyncpa [#allocation4], 1 }
  0x6d   :  { %366 = vsyncpa [#allocation5], 1 }

</bundles_post_ra>
